<compile_context>
chip_gen: v6e
topology: v6e:2x2x1
jax: 0.10.0
libtpu: 0.0.40
codegen_flags: <defaults>
</compile_context>

<pallas_src>
import functools

import numpy as np
import jax
import jax.numpy as jnp
from jax.experimental import pallas as pl
from jax.experimental.pallas import tpu as pltpu


# ----------------------------- small helpers -----------------------------

def _round_up(x, m):
    return (x + m - 1) // m * m


def _layernorm(x, g, b, h_true, eps=1e-12):
    """Matches the custom torch LayerNorm (mean/var over last dim, eps inside sqrt),
    aware of zero-padded trailing lanes: padded lanes hold exactly 0, so each one adds
    u^2 to sum((x-u)^2); we subtract that and divide by the true hidden size."""
    hp = x.shape[-1]
    inv_h = 1.0 / float(h_true)
    u = jnp.sum(x, axis=-1, keepdims=True) * inv_h
    d = x - u
    var = (jnp.sum(d * d, axis=-1, keepdims=True) - float(hp - h_true) * u * u) * inv_h
    return d * jax.lax.rsqrt(var + eps) * g + b


def _gelu(x):
    # TODO(synk): reference gelu is the exact erf form; erf has no Mosaic lowering, so we
    # use the tanh approximation (EUP tanh, |diff| < ~1e-3, covered by the tolerance).
    c = 0.7978845608028654  # sqrt(2/pi)
    return 0.5 * x * (1.0 + jnp.tanh(c * (x + 0.044715 * x * x * x)))


# --------------------------------- fused kernel --------------------------------

def fused_encoder_kernel(x_ref, epack_ref, cbig_ref, dbig_ref,
                         wf_ref, w1_ref, w2_ref, vpack_ref,
                         o_ref, h_ref, *, h_true):
    f32 = jnp.float32
    bf16 = jnp.bfloat16
    layer = pl.program_id(1)
    n_layers = pl.num_programs(1)

    BtL, Hp = h_ref.shape            # (Bt*L, Hp)
    Kp2 = wf_ref.shape[1]            # 2*Kp  (padded rfft bins, stacked [Wr; Wi])
    Kp = Kp2 // 2
    Bt = cbig_ref.shape[0] // Kp2    # batch rows per grid step
    L = BtL // Bt
    lpad = epack_ref.shape[0] - 8    # row index of the embedding-LN gamma

    # ---- layer 0: (item_emb + position_emb) -> LayerNorm, into the resident scratch ----
    @pl.when(layer == 0)
    def _():
        pos = epack_ref[0:L, :]                               # (L, Hp), un-tiled in HBM
        if Bt > 1:
            pos = jnp.concatenate([pos] * Bt, axis=0)         # broadcast over batch tile
        g0 = epack_ref[lpad:lpad + 1, :]
        b0 = epack_ref[lpad + 1:lpad + 2, :]
        h_ref[...] = _layernorm(x_ref[...] + pos, g0, b0, h_true)

    h = h_ref[...]                                            # (Bt*L, Hp) f32
    hb = h.astype(bf16)

    # per-layer small vectors packed into a single (8, FFp) block
    vp = vpack_ref[0]
    b1 = vp[0:1, :]
    ln1_g, ln1_b = vp[1:2, :Hp], vp[2:3, :Hp]
    ln2_g, ln2_b = vp[3:4, :Hp], vp[4:5, :Hp]
    b2 = vp[5:6, :Hp]

    # ---- FilterLayer: rfft -> complex weight -> irfft (norm='ortho') ----
    # forward: one non-redundant [Cr; Ci] (block-diag over the batch tile) matmul
    s = jnp.dot(cbig_ref[...], hb, preferred_element_type=f32)        # (Bt*2Kp, Hp)
    wf = wf_ref[0]                                                    # (2Kp, Hp)=[Wr;Wi]
    wr = wf[0:Kp, :]
    wi = wf[Kp:Kp2, :]
    pieces = []
    for b in range(Bt):                                               # static trace-time
        xr = s[b * Kp2:b * Kp2 + Kp, :]
        xi = s[b * Kp2 + Kp:(b + 1) * Kp2, :]
        pieces.append(xr * wr - xi * wi)                              # Re' (VPU)
        pieces.append(xr * wi + xi * wr)                              # Im' (VPU)
    g = jnp.concatenate(pieces, axis=0).astype(bf16)                  # (Bt*2Kp, Hp)
    # inverse: one [Dr | Di] (block-diag) matmul
    y = jnp.dot(dbig_ref[...], g, preferred_element_type=f32)         # (Bt*L, Hp)
    h1 = _layernorm(y + h, ln1_g, ln1_b, h_true)                      # residual + LN

    # ---- Intermediate (feed-forward) ----
    t = jnp.dot(h1.astype(bf16), w1_ref[0], preferred_element_type=f32) + b1
    t = _gelu(t)
    t = jnp.dot(t.astype(bf16), w2_ref[0], preferred_element_type=f32) + b2
    h2 = _layernorm(t + h1, ln2_g, ln2_b, h_true)                     # residual + LN

    @pl.when(layer < n_layers - 1)
    def _():
        h_ref[...] = h2                                               # carry to next layer

    @pl.when(layer == n_layers - 1)
    def _():
        o_ref[...] = h2


# ------------------------------- pallas wrapper --------------------------------

def fmlp_encoder(x, pk):
    """x: (B, L, H) f32 log-sequence item embeddings; pk: packed encoder params."""
    B, L, H = x.shape
    Bt, Hp, FFp, Kp = pk["Bt"], pk["Hp"], pk["FFp"], pk["Kp"]
    assert B % Bt == 0
    nBT = B // Bt
    BtL = Bt * L
    assert BtL % 8 == 0 and Hp % 128 == 0 and FFp % 128 == 0
    NL = pk["wfilt"].shape[0]

    # zero-pad the hidden dim to a lane-dense multiple of 128 (cheap XLA pad/reshape)
    xp = jnp.pad(x, ((0, 0), (0, 0), (0, Hp - H))).reshape(B * L, Hp)

    # explicit VMEM budget from the actual (double-buffered) blocks + resident scratch
    f32b, bf16b = 4, 2
    est = (2 * (2 * BtL * Hp * f32b                       # x in + out blocks
                + 2 * Kp * Hp * f32b                      # per-layer [Wr;Wi] block
                + Hp * FFp * bf16b + FFp * Hp * bf16b     # per-layer dense_1/dense_2
                + 8 * FFp * f32b)                         # per-layer LN/bias pack
           + 2 * (pk["epack"].size * f32b
                  + pk["cbig"].size * bf16b
                  + pk["dbig"].size * bf16b)              # grid-invariant operands
           + BtL * Hp * f32b)                             # resident activation scratch
    vmem_limit = int(min(max(4 * est, 32 << 20), 56 << 20))   # stays under v7x's 64 MiB

    out = pl.pallas_call(
        functools.partial(fused_encoder_kernel, h_true=H),
        out_shape=jax.ShapeDtypeStruct((B * L, Hp), jnp.float32),
        grid=(nBT, NL),
        in_specs=[
            pl.BlockSpec((BtL, Hp), lambda i, l: (i, 0)),            # item embeddings
            # the next three are grid-invariant (constant index_map -> fetched once)
            pl.BlockSpec(pk["epack"].shape, lambda i, l: (0, 0)),    # pos emb + emb-LN
            pl.BlockSpec(pk["cbig"].shape, lambda i, l: (0, 0)),     # fwd DFT  [Cr;Ci]
            pl.BlockSpec(pk["dbig"].shape, lambda i, l: (0, 0)),     # inv DFT  [Dr|Di]
            pl.BlockSpec((1, 2 * Kp, Hp), lambda i, l: (l, 0, 0)),   # per-layer [Wr;Wi]
            pl.BlockSpec((1, Hp, FFp), lambda i, l: (l, 0, 0)),      # per-layer dense_1
            pl.BlockSpec((1, FFp, Hp), lambda i, l: (l, 0, 0)),      # per-layer dense_2
            pl.BlockSpec((1, 8, FFp), lambda i, l: (l, 0, 0)),       # per-layer LN/bias
        ],
        out_specs=pl.BlockSpec((BtL, Hp), lambda i, l: (i, 0)),
        scratch_shapes=[pltpu.VMEM((BtL, Hp), jnp.float32)],         # resident activation
        compiler_params=pltpu.CompilerParams(
            dimension_semantics=("parallel", "arbitrary"),
            vmem_limit_bytes=vmem_limit),
    )(xp, pk["epack"], pk["cbig"], pk["dbig"],
      pk["wfilt"], pk["w1"], pk["w2"], pk["vpack"])
    return out.reshape(B, L, Hp)[:, :, :H]


# -------------------------- parameter / operator packing ------------------------

def _dft_matrices_np(L, Kp):
    """Real matrices implementing torch.fft.rfft / irfft(norm='ortho') along the seq
    axis, with the K = L//2+1 frequency bins zero-padded to Kp (multiple of 8)."""
    K = L // 2 + 1
    n = np.arange(L)
    k = np.arange(K)
    s = 1.0 / np.sqrt(L)
    ang_kn = 2.0 * np.pi * np.outer(k, n) / L             # (K, L)
    Cr = np.zeros((Kp, L), np.float32)
    Ci = np.zeros((Kp, L), np.float32)
    Cr[:K] = np.cos(ang_kn) * s
    Ci[:K] = -np.sin(ang_kn) * s
    c = np.full((K,), 2.0)
    c[0] = 1.0
    if L % 2 == 0:
        c[-1] = 1.0
    ang_nk = 2.0 * np.pi * np.outer(n, k) / L             # (L, K)
    Dr = np.zeros((L, Kp), np.float32)
    Di = np.zeros((L, Kp), np.float32)
    Dr[:, :K] = np.cos(ang_nk) * c[None, :] * s
    Di[:, :K] = -np.sin(ang_nk) * c[None, :] * s
    return Cr, Ci, Dr, Di


def _pick_batch_tile(B, L, max_rows=128):
    """Largest Bt dividing B with Bt*L <= one MXU K tile and nBT = B/Bt >= 2 (so the
    parallel grid axis can shard across v7x's two TensorCores)."""
    best = 1
    for bt in range(1, B + 1):
        if B % bt or (bt * L) % 8 or bt * L > max_rows:
            continue
        if B // bt < 2 and not (B == 1 and bt == 1):
            continue
        best = bt
    return best


def pack_encoder_params(params, L, Bt):
    """Host-side packing: lane-padded weights, non-redundant DFT operators, stacked
    per-layer params (filter weights are NOT Bt-tiled)."""
    H = int(params["ln_g"].shape[0])
    layers = params["layers"]
    FF = int(layers[0]["w1"].shape[1])
    Hp = _round_up(H, 128)
    FFp = _round_up(FF, 128)
    K = L // 2 + 1
    Kp = _round_up(K, 8)
    Lpad = _round_up(L, 8)

    Cr, Ci, Dr, Di = _dft_matrices_np(L, Kp)
    C2 = np.concatenate([Cr, Ci], axis=0)                 # (2Kp, L)   non-redundant fwd
    D2 = np.concatenate([Dr, Di], axis=1)                 # (L, 2Kp)   [Dr | Di] inverse
    eye = np.eye(Bt, dtype=np.float32)
    cbig = np.kron(eye, C2)                               # (Bt*2Kp, Bt*L)
    dbig = np.kron(eye, D2)                               # (Bt*L, Bt*2Kp)

    wf_all, w1_all, w2_all, vp_all = [], [], [], []
    for lp in layers:
        wf = np.zeros((2 * Kp, Hp), np.float32)           # [Wr; Wi], un-tiled
        wf[:K, :H] = np.asarray(lp["wr"])
        wf[Kp:Kp + K, :H] = np.asarray(lp["wi"])
        wf_all.append(wf)
        w1p = np.zeros((Hp, FFp), np.float32)
        w1p[:H, :FF] = np.asarray(lp["w1"])
        w1_all.append(w1p)
        w2p = np.zeros((FFp, Hp), np.float32)
        w2p[:FF, :H] = np.asarray(lp["w2"])
        w2_all.append(w2p)
        vp = np.zeros((8, FFp), np.float32)
        vp[0, :FF] = np.asarray(lp["b1"])
        vp[1, :H] = np.asarray(lp["ln1_g"])
        vp[2, :H] = np.asarray(lp["ln1_b"])
        vp[3, :H] = np.asarray(lp["ln2_g"])
        vp[4, :H] = np.asarray(lp["ln2_b"])
        vp[5, :H] = np.asarray(lp["b2"])
        vp_all.append(vp)

    epack = np.zeros((Lpad + 8, Hp), np.float32)          # un-tiled position embeddings
    epack[:L, :H] = np.asarray(params["pos_emb"][:L])
    epack[Lpad, :H] = np.asarray(params["ln_g"])
    epack[Lpad + 1, :H] = np.asarray(params["ln_b"])

    return {
        "Bt": Bt, "Hp": Hp, "FFp": FFp, "Kp": Kp,
        "epack": jnp.asarray(epack, jnp.float32),
        "cbig": jnp.asarray(cbig, jnp.bfloat16),          # MXU operands in bf16
        "dbig": jnp.asarray(dbig, jnp.bfloat16),
        "wfilt": jnp.asarray(np.stack(wf_all), jnp.float32),   # elementwise -> keep f32
        "w1": jnp.asarray(np.stack(w1_all), jnp.bfloat16),
        "w2": jnp.asarray(np.stack(w2_all), jnp.bfloat16),
        "vpack": jnp.asarray(np.stack(vp_all), jnp.float32),
    }


def init_params(key, n_items, hidden, max_seq_len, num_blocks, L, init_range=0.02):
    K = L // 2 + 1
    ff = 4 * hidden
    keys = jax.random.split(key, 2 + 3 * num_blocks)
    item_emb = init_range * jax.random.normal(keys[0], (n_items + 1, hidden), jnp.float32)
    item_emb = item_emb.at[0].set(0.0)   # padding_idx=0
    p = {
        "item_emb": item_emb,
        "pos_emb": init_range * jax.random.normal(keys[1], (max_seq_len, hidden), jnp.float32),
        "ln_g": jnp.ones((hidden,), jnp.float32),
        "ln_b": jnp.zeros((hidden,), jnp.float32),
        "layers": [],
    }
    for l in range(num_blocks):
        k0, k1, k2 = keys[2 + 3 * l: 5 + 3 * l]
        cw = 0.02 * jax.random.normal(k0, (K, hidden, 2), jnp.float32)   # complex_weight
        layer = {
            "wr": cw[..., 0], "wi": cw[..., 1],
            "ln1_g": jnp.ones((hidden,), jnp.float32),
            "ln1_b": jnp.zeros((hidden,), jnp.float32),
            "w1": init_range * jax.random.normal(k1, (hidden, ff), jnp.float32),
            "b1": jnp.zeros((ff,), jnp.float32),
            "w2": init_range * jax.random.normal(k2, (ff, hidden), jnp.float32),
            "b2": jnp.zeros((hidden,), jnp.float32),
            "ln2_g": jnp.ones((hidden,), jnp.float32),
            "ln2_b": jnp.zeros((hidden,), jnp.float32),
        }
        p["layers"].append(layer)
    return p


# --------------------------------- forward ------------------------------------

def fmlprec_forward(params, packed, interaction_list, interaction_mask, neg_list):
    item_tab = params["item_emb"]
    # log_mask is computed in the source but unused by the FMLP encoder
    _ = interaction_mask[:, :-1].astype(jnp.float32)

    input_embs_all = item_tab[interaction_list]                # (B, S, H)  XLA gather
    input_logs = input_embs_all[:, :-1, :]                     # (B, L, H)
    target_pos = input_embs_all[:, 1:, :]                      # (B, L, H)
    target_neg = item_tab[neg_list][:, :-1, :]                 # (B, L, H)

    prec_vec = fmlp_encoder(input_logs, packed)                # single fused Pallas call
    return prec_vec, target_pos, target_neg, prec_vec


# ---------------------------- pure-JAX reference -------------------------------

def _ref_ln(x, g, b, eps=1e-12):
    u = x.mean(-1, keepdims=True)
    s = ((x - u) ** 2).mean(-1, keepdims=True)
    return (x - u) / jnp.sqrt(s + eps) * g + b


def _ref_gelu(x):
    return x * 0.5 * (1.0 + jax.scipy.special.erf(x / jnp.sqrt(2.0)))


def fmlprec_reference(params, interaction_list, neg_list):
    item_tab = params["item_emb"]
    pos_tab = params["pos_emb"]
    all_embs = item_tab[interaction_list]
    x = all_embs[:, :-1, :]
    L = x.shape[1]
    x = _ref_ln(x + pos_tab[:L][None], params["ln_g"], params["ln_b"])
    for lp in params["layers"]:
        w = lp["wr"] + 1j * lp["wi"]
        X = jnp.fft.rfft(x, axis=1, norm="ortho")
        y = jnp.fft.irfft(X * w[None], n=L, axis=1, norm="ortho").real.astype(jnp.float32)
        h = _ref_ln(y + x, lp["ln1_g"], lp["ln1_b"])
        t = _ref_gelu(h @ lp["w1"] + lp["b1"])
        t = t @ lp["w2"] + lp["b2"]
        x = _ref_ln(t + h, lp["ln2_g"], lp["ln2_b"])
    return x, all_embs[:, 1:, :], item_tab[neg_list][:, :-1, :]


# ----------------------------------- main --------------------------------------

if __name__ == "__main__":
    config = dict(n_items=50, hidden_units=32, maxlen=8, num_blocks=2,
                  dropout_rate=0.1, initializer_range=0.02)
    B = 2
    S = config["maxlen"] + 1          # max_seq_len
    L = config["maxlen"]              # encoder sequence length
    H = config["hidden_units"]

    key = jax.random.PRNGKey(0)
    kp, ki, kn = jax.random.split(key, 3)
    params = init_params(kp, config["n_items"], H, S, config["num_blocks"], L,
                         config["initializer_range"])

    Bt = _pick_batch_tile(B, L)       # nBT >= 2 so v7x megacore can split the batch axis
    packed = pack_encoder_params(params, L, Bt)

    interaction_list = jax.random.randint(ki, (B, S), 1, config["n_items"] + 1, jnp.int32)
    neg_list = jax.random.randint(kn, (B, S), 1, config["n_items"] + 1, jnp.int32)
    interaction_mask = jnp.ones((B, S), jnp.int32)

    prec_vec, target_pos, target_neg, prec_vec2 = fmlprec_forward(
        params, packed, interaction_list, interaction_mask, neg_list)
    jax.block_until_ready((prec_vec, target_pos, target_neg, prec_vec2))

    ref_prec, ref_pos, ref_neg = fmlprec_reference(params, interaction_list, neg_list)
    assert prec_vec.shape == (B, L, H)
    # tolerance widened slightly vs. pure-f32: matmul operands are bf16, gelu is tanh-approx
    assert np.allclose(np.asarray(prec_vec), np.asarray(ref_prec), atol=1e-2, rtol=1e-2)
    assert np.allclose(np.asarray(target_pos), np.asarray(ref_pos))
    assert np.allclose(np.asarray(target_neg), np.asarray(ref_neg))

    print("KERNEL_OK")
</pallas_src>

<mosaic_0001>
module attributes {stable_mosaic.version = 11 : i64} {
  func.func @fused_encoder_kernel(%arg0: i32, %arg1: i32, %arg2: memref<8x128xf32, #tpu.memory_space<vmem>>, %arg3: memref<16x128xf32, #tpu.memory_space<vmem>>, %arg4: memref<16x8xbf16, #tpu.memory_space<vmem>>, %arg5: memref<8x16xbf16, #tpu.memory_space<vmem>>, %arg6: memref<1x16x128xf32, #tpu.memory_space<vmem>>, %arg7: memref<1x128x128xbf16, #tpu.memory_space<vmem>>, %arg8: memref<1x128x128xbf16, #tpu.memory_space<vmem>>, %arg9: memref<1x8x128xf32, #tpu.memory_space<vmem>>, %arg10: memref<8x128xf32, #tpu.memory_space<vmem>>, %arg11: memref<8x128xf32, #tpu.memory_space<vmem>>) attributes {dimension_semantics = [#tpu.dimension_semantics<parallel>, #tpu.dimension_semantics<arbitrary>], iteration_bounds = array<i64: 2, 2>, scalar_prefetch = 0 : i64, scratch_operands = 1 : i64, tpu.core_type = #tpu.core_type<tc>, window_params = [{transform_indices = @transform_0, window_bounds = array<i64: 8, 128>}, {pipeline_mode = #tpu.pipeline_mode<synchronous>, transform_indices = @transform_1, window_bounds = array<i64: 16, 128>}, {pipeline_mode = #tpu.pipeline_mode<synchronous>, transform_indices = @transform_2, window_bounds = array<i64: 16, 8>}, {pipeline_mode = #tpu.pipeline_mode<synchronous>, transform_indices = @transform_3, window_bounds = array<i64: 8, 16>}, {transform_indices = @transform_4, window_bounds = array<i64: 1, 16, 128>}, {transform_indices = @transform_5, window_bounds = array<i64: 1, 128, 128>}, {transform_indices = @transform_6, window_bounds = array<i64: 1, 128, 128>}, {transform_indices = @transform_7, window_bounds = array<i64: 1, 8, 128>}, {transform_indices = @transform_8, window_bounds = array<i64: 8, 128>}]} {
    %c0_i32 = arith.constant 0 : i32
    %0 = arith.cmpi eq, %arg1, %c0_i32 : i32
    %1 = arith.extui %0 : i1 to i32
    %c0_i32_0 = arith.constant 0 : i32
    %2 = arith.cmpi ne, %1, %c0_i32_0 : i32
    scf.if %2 {
      %c0_40 = arith.constant 0 : index
      %c0_41 = arith.constant 0 : index
      %112 = vector.load %arg3[%c0_40, %c0_41] : memref<16x128xf32, #tpu.memory_space<vmem>>, vector<8x128xf32>
      %c8 = arith.constant 8 : index
      %c0_42 = arith.constant 0 : index
      %113 = vector.load %arg3[%c8, %c0_42] : memref<16x128xf32, #tpu.memory_space<vmem>>, vector<1x128xf32>
      %c9 = arith.constant 9 : index
      %c0_43 = arith.constant 0 : index
      %114 = vector.load %arg3[%c9, %c0_43] : memref<16x128xf32, #tpu.memory_space<vmem>>, vector<1x128xf32>
      %c0_44 = arith.constant 0 : index
      %c0_45 = arith.constant 0 : index
      %115 = vector.load %arg2[%c0_44, %c0_45] : memref<8x128xf32, #tpu.memory_space<vmem>>, vector<8x128xf32>
      %116 = arith.addf %115, %112 : vector<8x128xf32>
      %cst_46 = arith.constant dense<0.000000e+00> : vector<8xf32>
      %117 = vector.multi_reduction <add>, %116, %cst_46 [1] : vector<8x128xf32> to vector<8xf32>
      %118 = vector.shape_cast %117 : vector<8xf32> to vector<8x1xf32>
      %cst_47 = arith.constant 3.125000e-02 : f32
      %119 = vector.broadcast %cst_47 : f32 to vector<8x1xf32>
      %120 = arith.mulf %118, %119 : vector<8x1xf32>
      %121 = vector.broadcast %120 : vector<8x1xf32> to vector<8x128xf32>
      %122 = arith.subf %116, %121 : vector<8x128xf32>
      %123 = arith.mulf %122, %122 : vector<8x128xf32>
      %cst_48 = arith.constant dense<0.000000e+00> : vector<8xf32>
      %124 = vector.multi_reduction <add>, %123, %cst_48 [1] : vector<8x128xf32> to vector<8xf32>
      %125 = vector.shape_cast %124 : vector<8xf32> to vector<8x1xf32>
      %cst_49 = arith.constant 9.600000e+01 : f32
      %126 = vector.broadcast %cst_49 : f32 to vector<8x1xf32>
      %127 = arith.mulf %126, %120 : vector<8x1xf32>
      %128 = arith.mulf %127, %120 : vector<8x1xf32>
      %129 = arith.subf %125, %128 : vector<8x1xf32>
      %cst_50 = arith.constant 3.125000e-02 : f32
      %130 = vector.broadcast %cst_50 : f32 to vector<8x1xf32>
      %131 = arith.mulf %129, %130 : vector<8x1xf32>
      %cst_51 = arith.constant 9.99999996E-13 : f32
      %132 = vector.broadcast %cst_51 : f32 to vector<8x1xf32>
      %133 = arith.addf %131, %132 : vector<8x1xf32>
      %134 = math.rsqrt %133 : vector<8x1xf32>
      %135 = vector.broadcast %134 : vector<8x1xf32> to vector<8x128xf32>
      %136 = arith.mulf %122, %135 : vector<8x128xf32>
      %137 = vector.broadcast %113 : vector<1x128xf32> to vector<8x128xf32>
      %138 = arith.mulf %136, %137 : vector<8x128xf32>
      %139 = vector.broadcast %114 : vector<1x128xf32> to vector<8x128xf32>
      %140 = arith.addf %138, %139 : vector<8x128xf32>
      %c0_52 = arith.constant 0 : index
      %c0_53 = arith.constant 0 : index
      %141 = vector.load %arg11[%c0_52, %c0_53] : memref<8x128xf32, #tpu.memory_space<vmem>>, vector<8x128xf32>
      tpu.vector_store %arg11[%c0_52, %c0_53], %140 {strides = array<i32>} : memref<8x128xf32, #tpu.memory_space<vmem>>, vector<8x128xf32>,
    } else {
    }
    %c0 = arith.constant 0 : index
    %c0_1 = arith.constant 0 : index
    %3 = vector.load %arg11[%c0, %c0_1] : memref<8x128xf32, #tpu.memory_space<vmem>>, vector<8x128xf32>
    %4 = arith.truncf %3 : vector<8x128xf32> to vector<8x128xbf16>
    %c0_2 = arith.constant 0 : index
    %c0_3 = arith.constant 0 : index
    %c0_4 = arith.constant 0 : index
    %5 = vector.load %arg9[%c0_2, %c0_3, %c0_4] : memref<1x8x128xf32, #tpu.memory_space<vmem>>, vector<1x8x128xf32>
    %6 = vector.shape_cast %5 : vector<1x8x128xf32> to vector<8x128xf32>
    %7 = vector.extract_strided_slice %6 {offsets = [0, 0], sizes = [1, 128], strides = [1, 1]} : vector<8x128xf32> to vector<1x128xf32>
    %8 = vector.extract_strided_slice %6 {offsets = [1, 0], sizes = [1, 128], strides = [1, 1]} : vector<8x128xf32> to vector<1x128xf32>
    %9 = vector.extract_strided_slice %6 {offsets = [2, 0], sizes = [1, 128], strides = [1, 1]} : vector<8x128xf32> to vector<1x128xf32>
    %10 = vector.extract_strided_slice %6 {offsets = [3, 0], sizes = [1, 128], strides = [1, 1]} : vector<8x128xf32> to vector<1x128xf32>
    %11 = vector.extract_strided_slice %6 {offsets = [4, 0], sizes = [1, 128], strides = [1, 1]} : vector<8x128xf32> to vector<1x128xf32>
    %12 = vector.extract_strided_slice %6 {offsets = [5, 0], sizes = [1, 128], strides = [1, 1]} : vector<8x128xf32> to vector<1x128xf32>
    %c0_5 = arith.constant 0 : index
    %c0_6 = arith.constant 0 : index
    %13 = vector.load %arg4[%c0_5, %c0_6] : memref<16x8xbf16, #tpu.memory_space<vmem>>, vector<16x8xbf16>
    %cst = arith.constant dense<0.000000e+00> : vector<16x128xf32>
    %14 = tpu.matmul %13, %4, %cst {dimension_numbers = #tpu.dot_dimension_numbers<[1], [0], [0], [1], [0, 0, 1, 1], [], []>} : vector<16x8xbf16>, vector<8x128xbf16>, vector<16x128xf32> -> vector<16x128xf32>
    %c0_7 = arith.constant 0 : index
    %c0_8 = arith.constant 0 : index
    %c0_9 = arith.constant 0 : index
    %15 = vector.load %arg6[%c0_7, %c0_8, %c0_9] : memref<1x16x128xf32, #tpu.memory_space<vmem>>, vector<1x16x128xf32>
    %16 = vector.shape_cast %15 : vector<1x16x128xf32> to vector<16x128xf32>
    %17 = vector.extract_strided_slice %16 {offsets = [0, 0], sizes = [8, 128], strides = [1, 1]} : vector<16x128xf32> to vector<8x128xf32>
    %18 = vector.extract_strided_slice %16 {offsets = [8, 0], sizes = [8, 128], strides = [1, 1]} : vector<16x128xf32> to vector<8x128xf32>
    %19 = vector.extract_strided_slice %14 {offsets = [0, 0], sizes = [8, 128], strides = [1, 1]} : vector<16x128xf32> to vector<8x128xf32>
    %20 = vector.extract_strided_slice %14 {offsets = [8, 0], sizes = [8, 128], strides = [1, 1]} : vector<16x128xf32> to vector<8x128xf32>
    %21 = arith.mulf %19, %17 : vector<8x128xf32>
    %22 = arith.mulf %20, %18 : vector<8x128xf32>
    %23 = arith.subf %21, %22 : vector<8x128xf32>
    %24 = arith.mulf %19, %18 : vector<8x128xf32>
    %25 = arith.mulf %20, %17 : vector<8x128xf32>
    %26 = arith.addf %24, %25 : vector<8x128xf32>
    %27 = tpu.concatenate %23, %26 in 0 : vector<8x128xf32>, vector<8x128xf32> -> vector<16x128xf32>
    %28 = arith.truncf %27 : vector<16x128xf32> to vector<16x128xbf16>
    %c0_10 = arith.constant 0 : index
    %c0_11 = arith.constant 0 : index
    %29 = vector.load %arg5[%c0_10, %c0_11] : memref<8x16xbf16, #tpu.memory_space<vmem>>, vector<8x16xbf16>
    %cst_12 = arith.constant dense<0.000000e+00> : vector<8x128xf32>
    %30 = tpu.matmul %29, %28, %cst_12 {dimension_numbers = #tpu.dot_dimension_numbers<[1], [0], [0], [1], [0, 0, 1, 1], [], []>} : vector<8x16xbf16>, vector<16x128xbf16>, vector<8x128xf32> -> vector<8x128xf32>
    %31 = arith.addf %30, %3 : vector<8x128xf32>
    %cst_13 = arith.constant dense<0.000000e+00> : vector<8xf32>
    %32 = vector.multi_reduction <add>, %31, %cst_13 [1] : vector<8x128xf32> to vector<8xf32>
    %33 = vector.shape_cast %32 : vector<8xf32> to vector<8x1xf32>
    %cst_14 = arith.constant 3.125000e-02 : f32
    %34 = vector.broadcast %cst_14 : f32 to vector<8x1xf32>
    %35 = arith.mulf %33, %34 : vector<8x1xf32>
    %36 = vector.broadcast %35 : vector<8x1xf32> to vector<8x128xf32>
    %37 = arith.subf %31, %36 : vector<8x128xf32>
    %38 = arith.mulf %37, %37 : vector<8x128xf32>
    %cst_15 = arith.constant dense<0.000000e+00> : vector<8xf32>
    %39 = vector.multi_reduction <add>, %38, %cst_15 [1] : vector<8x128xf32> to vector<8xf32>
    %40 = vector.shape_cast %39 : vector<8xf32> to vector<8x1xf32>
    %cst_16 = arith.constant 9.600000e+01 : f32
    %41 = vector.broadcast %cst_16 : f32 to vector<8x1xf32>
    %42 = arith.mulf %41, %35 : vector<8x1xf32>
    %43 = arith.mulf %42, %35 : vector<8x1xf32>
    %44 = arith.subf %40, %43 : vector<8x1xf32>
    %cst_17 = arith.constant 3.125000e-02 : f32
    %45 = vector.broadcast %cst_17 : f32 to vector<8x1xf32>
    %46 = arith.mulf %44, %45 : vector<8x1xf32>
    %cst_18 = arith.constant 9.99999996E-13 : f32
    %47 = vector.broadcast %cst_18 : f32 to vector<8x1xf32>
    %48 = arith.addf %46, %47 : vector<8x1xf32>
    %49 = math.rsqrt %48 : vector<8x1xf32>
    %50 = vector.broadcast %49 : vector<8x1xf32> to vector<8x128xf32>
    %51 = arith.mulf %37, %50 : vector<8x128xf32>
    %52 = vector.broadcast %8 : vector<1x128xf32> to vector<8x128xf32>
    %53 = arith.mulf %51, %52 : vector<8x128xf32>
    %54 = vector.broadcast %9 : vector<1x128xf32> to vector<8x128xf32>
    %55 = arith.addf %53, %54 : vector<8x128xf32>
    %56 = arith.truncf %55 : vector<8x128xf32> to vector<8x128xbf16>
    %c0_19 = arith.constant 0 : index
    %c0_20 = arith.constant 0 : index
    %c0_21 = arith.constant 0 : index
    %57 = vector.load %arg7[%c0_19, %c0_20, %c0_21] : memref<1x128x128xbf16, #tpu.memory_space<vmem>>, vector<1x128x128xbf16>
    %58 = vector.shape_cast %57 : vector<1x128x128xbf16> to vector<128x128xbf16>
    %cst_22 = arith.constant dense<0.000000e+00> : vector<8x128xf32>
    %59 = tpu.matmul %56, %58, %cst_22 {dimension_numbers = #tpu.dot_dimension_numbers<[1], [0], [0], [1], [0, 0, 1, 1], [], []>} : vector<8x128xbf16>, vector<128x128xbf16>, vector<8x128xf32> -> vector<8x128xf32>
    %60 = vector.broadcast %7 : vector<1x128xf32> to vector<8x128xf32>
    %61 = arith.addf %59, %60 : vector<8x128xf32>
    %cst_23 = arith.constant 5.000000e-01 : f32
    %62 = vector.broadcast %cst_23 : f32 to vector<8x128xf32>
    %63 = arith.mulf %62, %61 : vector<8x128xf32>
    %cst_24 = arith.constant 4.471500e-02 : f32
    %64 = vector.broadcast %cst_24 : f32 to vector<8x128xf32>
    %65 = arith.mulf %64, %61 : vector<8x128xf32>
    %66 = arith.mulf %65, %61 : vector<8x128xf32>
    %67 = arith.mulf %66, %61 : vector<8x128xf32>
    %68 = arith.addf %61, %67 : vector<8x128xf32>
    %cst_25 = arith.constant 0.797884583 : f32
    %69 = vector.broadcast %cst_25 : f32 to vector<8x128xf32>
    %70 = arith.mulf %69, %68 : vector<8x128xf32>
    %71 = math.tanh %70 : vector<8x128xf32>
    %cst_26 = arith.constant 1.000000e+00 : f32
    %72 = vector.broadcast %cst_26 : f32 to vector<8x128xf32>
    %73 = arith.addf %72, %71 : vector<8x128xf32>
    %74 = arith.mulf %63, %73 : vector<8x128xf32>
    %75 = arith.truncf %74 : vector<8x128xf32> to vector<8x128xbf16>
    %c0_27 = arith.constant 0 : index
    %c0_28 = arith.constant 0 : index
    %c0_29 = arith.constant 0 : index
    %76 = vector.load %arg8[%c0_27, %c0_28, %c0_29] : memref<1x128x128xbf16, #tpu.memory_space<vmem>>, vector<1x128x128xbf16>
    %77 = vector.shape_cast %76 : vector<1x128x128xbf16> to vector<128x128xbf16>
    %cst_30 = arith.constant dense<0.000000e+00> : vector<8x128xf32>
    %78 = tpu.matmul %75, %77, %cst_30 {dimension_numbers = #tpu.dot_dimension_numbers<[1], [0], [0], [1], [0, 0, 1, 1], [], []>} : vector<8x128xbf16>, vector<128x128xbf16>, vector<8x128xf32> -> vector<8x128xf32>
    %79 = vector.broadcast %12 : vector<1x128xf32> to vector<8x128xf32>
    %80 = arith.addf %78, %79 : vector<8x128xf32>
    %81 = arith.addf %80, %55 : vector<8x128xf32>
    %cst_31 = arith.constant dense<0.000000e+00> : vector<8xf32>
    %82 = vector.multi_reduction <add>, %81, %cst_31 [1] : vector<8x128xf32> to vector<8xf32>
    %83 = vector.shape_cast %82 : vector<8xf32> to vector<8x1xf32>
    %cst_32 = arith.constant 3.125000e-02 : f32
    %84 = vector.broadcast %cst_32 : f32 to vector<8x1xf32>
    %85 = arith.mulf %83, %84 : vector<8x1xf32>
    %86 = vector.broadcast %85 : vector<8x1xf32> to vector<8x128xf32>
    %87 = arith.subf %81, %86 : vector<8x128xf32>
    %88 = arith.mulf %87, %87 : vector<8x128xf32>
    %cst_33 = arith.constant dense<0.000000e+00> : vector<8xf32>
    %89 = vector.multi_reduction <add>, %88, %cst_33 [1] : vector<8x128xf32> to vector<8xf32>
    %90 = vector.shape_cast %89 : vector<8xf32> to vector<8x1xf32>
    %cst_34 = arith.constant 9.600000e+01 : f32
    %91 = vector.broadcast %cst_34 : f32 to vector<8x1xf32>
    %92 = arith.mulf %91, %85 : vector<8x1xf32>
    %93 = arith.mulf %92, %85 : vector<8x1xf32>
    %94 = arith.subf %90, %93 : vector<8x1xf32>
    %cst_35 = arith.constant 3.125000e-02 : f32
    %95 = vector.broadcast %cst_35 : f32 to vector<8x1xf32>
    %96 = arith.mulf %94, %95 : vector<8x1xf32>
    %cst_36 = arith.constant 9.99999996E-13 : f32
    %97 = vector.broadcast %cst_36 : f32 to vector<8x1xf32>
    %98 = arith.addf %96, %97 : vector<8x1xf32>
    %99 = math.rsqrt %98 : vector<8x1xf32>
    %100 = vector.broadcast %99 : vector<8x1xf32> to vector<8x128xf32>
    %101 = arith.mulf %87, %100 : vector<8x128xf32>
    %102 = vector.broadcast %10 : vector<1x128xf32> to vector<8x128xf32>
    %103 = arith.mulf %101, %102 : vector<8x128xf32>
    %104 = vector.broadcast %11 : vector<1x128xf32> to vector<8x128xf32>
    %105 = arith.addf %103, %104 : vector<8x128xf32>
    %c1_i32 = arith.constant 1 : i32
    %106 = arith.cmpi slt, %arg1, %c1_i32 : i32
    %107 = arith.extui %106 : i1 to i32
    %c0_i32_37 = arith.constant 0 : i32
    %108 = arith.cmpi ne, %107, %c0_i32_37 : i32
    scf.if %108 {
      %c0_40 = arith.constant 0 : index
      %c0_41 = arith.constant 0 : index
      %112 = vector.load %arg11[%c0_40, %c0_41] : memref<8x128xf32, #tpu.memory_space<vmem>>, vector<8x128xf32>
      tpu.vector_store %arg11[%c0_40, %c0_41], %105 {strides = array<i32>} : memref<8x128xf32, #tpu.memory_space<vmem>>, vector<8x128xf32>,
    } else {
    }
    %c1_i32_38 = arith.constant 1 : i32
    %109 = arith.cmpi eq, %arg1, %c1_i32_38 : i32
    %110 = arith.extui %109 : i1 to i32
    %c0_i32_39 = arith.constant 0 : i32
    %111 = arith.cmpi ne, %110, %c0_i32_39 : i32
    scf.if %111 {
      %c0_40 = arith.constant 0 : index
      %c0_41 = arith.constant 0 : index
      %112 = vector.load %arg10[%c0_40, %c0_41] : memref<8x128xf32, #tpu.memory_space<vmem>>, vector<8x128xf32>
      tpu.vector_store %arg10[%c0_40, %c0_41], %105 {strides = array<i32>} : memref<8x128xf32, #tpu.memory_space<vmem>>, vector<8x128xf32>,
    } else {
    }
    return
  }
  func.func @transform_0(%arg0: i32, %arg1: i32) -> (i32, i32) {
    %c0_i32 = arith.constant 0 : i32
    %c0_i32_0 = arith.constant 0 : i32
    return %arg0, %c0_i32 : i32, i32
  }
  func.func @transform_1(%arg0: i32, %arg1: i32) -> (i32, i32) {
    %c0_i32 = arith.constant 0 : i32
    %c0_i32_0 = arith.constant 0 : i32
    %c0_i32_1 = arith.constant 0 : i32
    return %c0_i32, %c0_i32_0 : i32, i32
  }
  func.func @transform_2(%arg0: i32, %arg1: i32) -> (i32, i32) {
    %c0_i32 = arith.constant 0 : i32
    %c0_i32_0 = arith.constant 0 : i32
    %c0_i32_1 = arith.constant 0 : i32
    return %c0_i32, %c0_i32_0 : i32, i32
  }
  func.func @transform_3(%arg0: i32, %arg1: i32) -> (i32, i32) {
    %c0_i32 = arith.constant 0 : i32
    %c0_i32_0 = arith.constant 0 : i32
    %c0_i32_1 = arith.constant 0 : i32
    return %c0_i32, %c0_i32_0 : i32, i32
  }
  func.func @transform_4(%arg0: i32, %arg1: i32) -> (i32, i32, i32) {
    %c0_i32 = arith.constant 0 : i32
    %c0_i32_0 = arith.constant 0 : i32
    %c0_i32_1 = arith.constant 0 : i32
    return %arg1, %c0_i32, %c0_i32_0 : i32, i32, i32
  }
  func.func @transform_5(%arg0: i32, %arg1: i32) -> (i32, i32, i32) {
    %c0_i32 = arith.constant 0 : i32
    %c0_i32_0 = arith.constant 0 : i32
    %c0_i32_1 = arith.constant 0 : i32
    return %arg1, %c0_i32, %c0_i32_0 : i32, i32, i32
  }
  func.func @transform_6(%arg0: i32, %arg1: i32) -> (i32, i32, i32) {
    %c0_i32 = arith.constant 0 : i32
    %c0_i32_0 = arith.constant 0 : i32
    %c0_i32_1 = arith.constant 0 : i32
    return %arg1, %c0_i32, %c0_i32_0 : i32, i32, i32
  }
  func.func @transform_7(%arg0: i32, %arg1: i32) -> (i32, i32, i32) {
    %c0_i32 = arith.constant 0 : i32
    %c0_i32_0 = arith.constant 0 : i32
    %c0_i32_1 = arith.constant 0 : i32
    return %arg1, %c0_i32, %c0_i32_0 : i32, i32, i32
  }
  func.func @transform_8(%arg0: i32, %arg1: i32) -> (i32, i32) {
    %c0_i32 = arith.constant 0 : i32
    %c0_i32_0 = arith.constant 0 : i32
    return %arg0, %c0_i32 : i32, i32
  }
}

</mosaic_0001>

<bundles_post_ra>
// kernel: tpu_custom_call.1
= control target key start
LH: loop header
LB: loop body
LE: loop exit
PB: predicated region body
PF: predicated region fallthrough
CT: control target
= control target key end

     0   :  { %s2110_s0 = inlined_call_operand.hbm [shape: f32[16,128], index: 0, kind: input, shape index: {}]   ;;  %s2111_s1 = inlined_call_operand.hbm [shape: f32[16,128], index: 1, kind: input, shape index: {}]   ;;  %s2112_s2 = inlined_call_operand.vmem [shape: bf16[16,8], index: 2, kind: input, shape index: {}]   ;;  %s2113_s3 = inlined_call_operand.vmem [shape: bf16[8,16], index: 3, kind: input, shape index: {}]   ;;  %s2114_s4 = inlined_call_operand.hbm [shape: f32[2,16,128], index: 4, kind: input, shape index: {}]   ;;  %s2115_s5 = inlined_call_operand.hbm [shape: bf16[2,128,128], index: 5, kind: input, shape index: {}]   ;;  %s2116_s6 = inlined_call_operand.hbm [shape: bf16[2,128,128], index: 6, kind: input, shape index: {}]   ;;  %s2117_s7 = inlined_call_operand.vmem [shape: f32[2,8,128], index: 7, kind: input, shape index: {}]   ;;  %s2118_s8 = inlined_call_operand.hbm [shape: f32[16,128], index: 8, kind: output, shape index: {}]  }
   0x1   :  { %2131 = sst [smem:[#allocation24_spill]] %s2110_s0 }
   0x2   :  { %2132 = sst [smem:[#allocation25_spill]] %s2112_s2 }
   0x3   :  { %2133 = sst [smem:[#allocation26_spill]] %s2113_s3 }
   0x4   :  { %2134 = sst [smem:[#allocation27_spill]] %s2114_s4 }
   0x5   :  { %2135 = sst [smem:[#allocation28_spill]] %s2118_s8 }
   0x6   :  { %13 = vsyncpa [#allocation4], 0 }
   0x7   :  { %15 = vsyncpa [#allocation4 + $0x1], 0 }
   0x8   :  { %16 = vsyncpa [#allocation7], 0 }
   0x9   :  { %17 = vsyncpa [#allocation5], 0 }
   0xa   :  { %19 = vsyncpa [#allocation5 + $0x1], 0  ;;  %s1700_s27 = smov 0   ;;  %s1702_s28 = smov 0  }
   0xb   :  { %s1704_s29 = smov 0   ;;  %s1706_s30 = smov 0  }
   0xc   :  { %s1708_s9 = smov 0   ;;  %s1710_s10 = smov 0  }
   0xd   :  { %s1712_s11 = smov 0   ;;  %s1714_s12 = smov 0  }
   0xe   :  { %s1716_s13 = smov 0   ;;  %s1718_s14 = smov 0  }
   0xf   :  { %s1720_s15 = smov 0  }
  0x10 LB: > { %2136 = sst [smem:[#allocation16_spill]] %s1621_s10  ;;  %s1756_s16 = sadd.s32 4294967295, %s1641_s15   ;;  %s1641_s15 = sphi %s1720_s15, %s25_s15   ;;  %s1637_s14 = sphi %s1718_s14, %s2174_s14   ;;  %s1633_s13 = sphi %s1716_s13, %s2181_s13   ;;  %s1629_s12 = sphi %s1714_s12, %s2172_s12   ;;  %s1625_s11 = sphi %s1712_s11, %s2180_s11   ;;  %s1621_s10 = sphi %s1710_s10, %s2171_s10   ;;  %s1617_s9 = sphi %s1708_s9, %s2179_s9   ;;  %s1613_s30 = sphi %s1706_s30, %s2178_s30   ;;  %s1609_s29 = sphi %s1704_s29, %s2177_s29   ;;  %s1605_s28 = sphi %s1702_s28, %s2176_s28   ;;  %s1601_s27 = sphi %s1700_s27, %s2175_s27  }
  0x11   : > { %2137 = sst [smem:[#allocation17_spill]] %s1629_s12  ;;  %s1088_s17 = sadd.s32 4294967294, %s1641_s15  }
  0x12   : > { %2138 = sst [smem:[#allocation18_spill]] %s1637_s14  ;;  %s34_s18 = sadd.s32 1, %s1633_s13 }
  0x13   : > { %s37_s19 = sadd.s32 1, %s1637_s14  ;;  %p35_p0 = scmp.ge.s32.totalorder %s34_s18, 2 }
  0x14   : > { %s44_s20 = sadd.s32 1, %s1621_s10  ;;  %p51_p1 = scmp.ne.s32.totalorder %s1621_s10, %s1617_s9 }
  0x15   : > { %p52_p2 = scmp.eq.s32.totalorder %s1641_s15, 0  ;;  %s2183_s18 = smov (%p35_p0, %s34_s18), 0 }
  0x16   : > { %2139 = sst [smem:[#allocation19_spill]] %s2183_s18  ;;  %s2185_s19 = smov (!%p35_p0, %s37_s19), %s1637_s14 }
  0x17   : > { %p1773_p3 = por %p52_p2, %p51_p1  ;;  %p2123_p4 = scmp.ne.s32.totalorder %s1617_s9, %s1613_s30 }
  0x18   : > { %p39_p5 = scmp.ge.s32.totalorder %s2185_s19, 2  ;;  %s130_s22 = ssub.s32 %s1633_s13, %s2183_s18 }
  0x19   : > { %p131_p6 = scmp.eq.s32.totalorder %s130_s22, 0  ;;  %s133_s23 = sadd.s32 1, %s1609_s29 }
  0x1a   : > { %s2187_s19 = smov (%p39_p5, %s2185_s19), 0  ;;  %p140_p7 = scmp.ne.s32.totalorder %s1609_s29, %s1605_s28 }
  0x1b   : > { %2141 = sst [smem:[#allocation20_spill]] %s2187_s19  ;;  %s41_s25 = ssub.s32 %s1637_s14, %s2187_s19 }
  0x1c   : > { %s1785_s24 = scalar_select %p131_p6, %s1609_s29, %s133_s23  }
  0x1d   : > { %p42_p8 = scmp.eq.s32.totalorder %s41_s25, 0  ;;  %p1795_p10 = por %p140_p7, %p52_p2 }
  0x1e   : > { %2142 = sst [smem:[#allocation21_spill]] %s1785_s24  ;;  %p248_p11 = scmp.eq.s32.totalorder %s1756_s16, 3 }
  0x1f   : > { %s1801_s22 = scalar_select %p42_p8, %s1621_s10, %s44_s20  }
  0x20   : > { %p1806_p12 = por %p248_p11, %p51_p1  ;;  %p254_p13 = scmp.eq.s32.totalorder %s1088_s17, 3 }
  0x21   : > { %2144 = sst [smem:[#allocation22_spill]] %s1801_s22  ;;  %p1252_p5 = scmp.lt.s32.totalorder %s1641_s15, 4 }
  0x22   : > { %s2145_s18 = scalar_select %p1806_p12, 1, 0 }
  0x23   : > { %p1813_p0 = por %p254_p13, %p2123_p4  ;;  %s293_s25 = sand.u32 1, %s1641_s15  }
  0x24   : > { %s295_s19 = sand.u32 1, %s1621_s10   ;;  %s1093_s8 = sshll.u32 %s1637_s14, 7 }
  0x25   : > { %s2146_s23 = scalar_select %p1813_p0, 1, 0 }
  0x26   : > { %s1092_s24 = sshll.u32 %s295_s19, 3  ;;  %s2148_s0 = sld [smem:[#allocation24_spill]] }
  0x27   : > { %2147 = sst [smem:[#allocation23_spill]] %s2146_s23  ;;  %s297_s22 = scalar_lea.vmem [#allocation3], %s1092_s24 }
  0x28   : > { %s304_s2 = sshll.u32 %s297_s22, 4  ;;  %p1826_p1 = pnand %p1252_p5, %p1773_p3  ;;  %s305_s2 = int_to_ptr.vmem [resolvable:$true] %s304_s2 }
  0x29   : > { %p1832_p2 = pnand %p1252_p5, %p1795_p10  ;;  %s1836_s19 = scalar_lea.sflag [#allocation4], %s293_s25 }
  0x2a   : > { %p1377_p6 = pneg %p1826_p1  ;;  %s1388_s3 = scalar_lea.vmem %s305_s2, 128 }
  0x2b   : > { %p1389_p7 = scmp.ne.s32.totalorder %s305_s2, %s1388_s3 }
  0x2c   : > { %s302_s20 = scalar_lea.hbm %s2148_s0, %s1093_s8  ;;  %s1643_s8 = smov [#allocation3]  }
  0x2d   : > { %p1391_p8 = pnand %p1389_p7, %p1377_p6  ;;  %s1393_s12 = sshll.u32 %s1643_s8, 4  ;;  %s1394_s12 = int_to_ptr.vmem [resolvable:$false] %s1393_s12 }
  0x2e   : > { %s1395_s21 = scalar_lea.vmem %s1394_s12, 256  ;;  %p1396_p3 = scmp.lt.s32.totalorder %s305_s2, %s1394_s12 }
  0x2f   : > { %p1392_p11 = pneg %p1391_p8  ;;  %p1397_p13 = scmp.lt.s32.totalorder %s1395_s21, %s1388_s3 }
  0x31   : > { %p1398_p9 = por %p1397_p13, %p1396_p3 }
  0x33   : > { %p1399_p4 = pnand %p1398_p9, %p1392_p11 }
  0x35   : > { %1402 = shalt.err (!%p1399_p4)
}
  0x36   : > { %1237 = dma.hbm_to_vmem [thread:$0]  (!%p1826_p1), %s302_s20, 128, %s305_s2, %s1836_s19  }
  0x37   : > { %s313_s24 = sand.u32 1, %s1609_s29   ;;  %s1139_s22 = sshll.u32 %s1633_s13, 8 }
  0x38   : > { %s1094_s26 = sshll.u32 %s313_s24, 4  ;;  %s2151_s4 = sld [smem:[#allocation27_spill]] }
  0x39   : > { %s315_s12 = scalar_lea.vmem [#allocation8], %s1094_s26  ;;  %s1848_s21 = sshll.u32 %s313_s24, 6 }
  0x3a   : > { %s322_s3 = sshll.u32 %s315_s12, 4  ;;  %p1405_p4 = pneg %p1832_p2  ;;  %s323_s3 = int_to_ptr.vmem [resolvable:$true] %s322_s3 }
  0x3b   : > { %s1416_s17 = scalar_lea.vmem %s323_s3, 256  ;;  %s1644_s2 = smov [#allocation8]  }
  0x3c   : > { %p1417_p9 = scmp.ne.s32.totalorder %s323_s3, %s1416_s17  ;;  %s1421_s20 = sshll.u32 %s1644_s2, 4  ;;  %s1422_s20 = int_to_ptr.vmem [resolvable:$false] %s1421_s20 }
  0x3d   : > { %s1423_s14 = scalar_lea.vmem %s1422_s20, 512  ;;  %p1424_p1 = scmp.lt.s32.totalorder %s323_s3, %s1422_s20 }
  0x3e   : > { %s321_s0 = scalar_lea.hbm %s2151_s4, %s1139_s22  ;;  %p1419_p10 = pnand %p1417_p9, %p1405_p4 }
  0x3f   : > { %p1425_p6 = scmp.lt.s32.totalorder %s1423_s14, %s1416_s17 }
  0x40   : > { %p1420_p5 = pneg %p1419_p10 }
  0x41   : > { %p1426_p7 = por %p1425_p6, %p1424_p1 }
  0x43   : > { %p1427_p8 = pnand %p1426_p7, %p1420_p5 }
  0x45   : > { %1430 = shalt.err (!%p1427_p8)
}
  0x46   : > { %s2126_s24 = smov 128   ;;  %s2127_s26 = smov 8  }
  0x47   : > { %1240 = dma.hbm_to_vmem [thread:$0]  (!%p1832_p2), %s321_s0, 256, %s323_s3, %s1836_s19, %s2126_s24, %s2126_s24, %s2127_s26  }
  0x48   : > { %s1140_s22 = sshll.u32 %s1633_s13, 10  ;;  %s336_s25 = scalar_lea.vmem [#allocation9], %s1848_s21 }
  0x49   : > { %s343_s8 = sshll.u32 %s336_s25, 4  ;;  %s342_s17 = scalar_lea.hbm %s2115_s5, %s1140_s22  ;;  %s344_s8 = int_to_ptr.vmem [resolvable:$true] %s343_s8 }
  0x4a   : > { %s1444_s2 = scalar_lea.vmem %s344_s8, 1024  ;;  %s1647_s20 = smov [#allocation9]  }
  0x4b   : > { %p1445_p11 = scmp.ne.s32.totalorder %s344_s8, %s1444_s2  ;;  %s1449_s4 = sshll.u32 %s1647_s20, 4  ;;  %s1450_s4 = int_to_ptr.vmem [resolvable:$false] %s1449_s4 }
  0x4c   : > { %s1451_s10 = scalar_lea.vmem %s1450_s4, 2048  ;;  %p1452_p9 = scmp.lt.s32.totalorder %s344_s8, %s1450_s4 }
  0x4d   : > { %p1447_p3 = pnand %p1445_p11, %p1405_p4  ;;  %p1453_p10 = scmp.lt.s32.totalorder %s1451_s10, %s1444_s2 }
  0x4f   : > { %p1448_p13 = pneg %p1447_p3  ;;  %p1454_p5 = por %p1453_p10, %p1452_p9 }
  0x51   : > { %p1455_p1 = pnand %p1454_p5, %p1448_p13 }
  0x53   : > { %1458 = shalt.err (!%p1455_p1)
}
  0x54   : > { %s2128_s0 = smov 64   ;;  %s1649_s4 = smov 4  }
  0x55   : > { %1243 = dma.hbm_to_vmem [thread:$0]  (!%p1832_p2), %s342_s17, 1024, %s344_s8, %s1836_s19, %s2128_s0, %s2128_s0, %s1649_s4  }
  0x56   : > { %p58_p6 = scmp.eq.s32.totalorder %s1756_s16, 0  ;;  %p1089_p7 = scmp.ge.s32.totalorder %s1641_s15, 1 }
  0x57   : > { %p261_p8 = scmp.lt.s32.totalorder %s1641_s15, 5  ;;  %p2152_p11 = scmp.ne.s32.totalorder %s1617_s9, %s1613_s30 }
  0x58   : > { %p2154_p13 = scmp.ne.s32.totalorder %s1605_s28, %s1601_s27  ;;  %s1650_s8 = smov [#allocation6]  }
  0x59   : > { %p1885_p3 = por %p58_p6, %p2152_p11  ;;  %p1898_p10 = pnand %p1089_p7, %p261_p8 }
  0x5a   : > { %p1894_p9 = por %p2154_p13, %p58_p6  ;;  %s273_s14 = sshll.u32 %s1650_s8, 4  ;;  %s1909_s14 = int_to_ptr.vmem [resolvable:$true] %s273_s14 }
  0x5b   : > { %p1230_p5 = pneg %p1898_p10  ;;  %s363_s2 = scalar_lea.hbm %s2116_s6, %s1140_s22 }
  0x5c   : > { %s2155_s3 = scalar_select %p1894_p9, 1, 0 }
  0x5d   : > { %s357_s27 = scalar_lea.vmem [#allocation10], %s1848_s21  ;;  %p1914_p1 = pnand %p1230_p5, %p58_p6 }
  0x5e   : > { %s364_s20 = sshll.u32 %s357_s27, 4  ;;  %s1651_s8 = smov [#allocation10]   ;;  %s365_s20 = int_to_ptr.vmem [resolvable:$true] %s364_s20 }
  0x5f   : > { %s1472_s26 = scalar_lea.vmem %s365_s20, 1024  ;;  %s1477_s0 = sshll.u32 %s1651_s8, 4  ;;  %s1478_s0 = int_to_ptr.vmem [resolvable:$false] %s1477_s0 }
  0x60   : > { %p1473_p7 = scmp.ne.s32.totalorder %s365_s20, %s1472_s26  ;;  %s1479_s22 = scalar_lea.vmem %s1478_s0, 2048 }
  0x61   : > { %p1480_p13 = scmp.lt.s32.totalorder %s365_s20, %s1478_s0  ;;  %p1481_p0 = scmp.lt.s32.totalorder %s1479_s22, %s1472_s26 }
  0x62   : > { %p1475_p8 = pnand %p1473_p7, %p1405_p4 }
  0x63   : > { %p1482_p12 = por %p1481_p0, %p1480_p13 }
  0x64   : > { %p1476_p11 = pneg %p1475_p8 }
  0x66   : > { %p1483_p9 = pnand %p1482_p12, %p1476_p11 }
  0x68   : > { %1486 = shalt.err (!%p1483_p9)
}
  0x69   : > { %s2158_s21 = smov 64   ;;  %p1489_p4 = pneg %p1914_p1 }
  0x6a   : > { %1246 = dma.hbm_to_vmem [thread:$0]  (!%p1832_p2), %s363_s2, 1024, %s365_s20, %s1836_s19, %s2158_s21, %s2158_s21, %s1649_s4  }
  0x6b   : > { %s1498_s12 = scalar_lea.vmem %s1909_s14, 256  ;;  %p1506_p12 = scmp.lt.s32.totalorder %s1909_s14, %s1909_s14 }
  0x6c   : > { %p1499_p5 = scmp.ne.s32.totalorder %s1909_s14, %s1498_s12  ;;  %p1507_p0 = scmp.lt.s32.totalorder %s1498_s12, %s1498_s12 }
  0x6e   : > { %p1501_p7 = pnand %p1499_p5, %p1489_p4  ;;  %p1508_p9 = por %p1507_p0, %p1506_p12 }
  0x70   : > { %p1502_p8 = pneg %p1501_p7 }
  0x72   : > { %p1509_p11 = pnand %p1508_p9, %p1502_p8 }
  0x74   : > { %1512 = shalt.err (!%p1509_p11)
}
  0x75   : > { %s2159_s23 = smov 8   ;;  %s2160_s26 = smov 128  }
  0x76   : > { %1233 = dma.hbm_to_vmem [thread:$0]  (!%p1914_p1), %s2111_s1, 256, %s1909_s14, [#allocation7], %s2160_s26, %s2160_s26, %s2159_s23  }
  0x77   : > { %383 = sbr.rel (%p1898_p10) target bundleno = 1942 (0x796), region = 52  ;;  %s385_s4 = sand.u32 (!%p1898_p10), 1, %s1756_s16  }
  0x78   : > { %s387_s17 = sand.u32 (!%p1898_p10), 1, %s1617_s9   ;;  %s386_s24 = scalar_lea.sflag (!%p1898_p10), [#allocation4], %s385_s4 }
  0x79   : > { %s1948_s2 = sshll.u32 (!%p1898_p10), %s387_s17, 3 }
  0x7a   : > { %s389_s27 = scalar_lea.vmem (!%p1898_p10), [#allocation3], %s1948_s2 }
  0x7c   : > { %1584 = dma.done.wait (%p1885_p3), %s386_s24, 128  }
  0x7d   : > { %1586 = vsyncadd (%p1885_p3), %s386_s24, 4294967168 }
  0x7e   : > { %1588 = dma.done.wait (%p58_p6), [#allocation7], 256  }
  0x7f   : > { %1590 = vsyncadd (%p58_p6), [#allocation7], 4294967040  ;;  %s400_s25 = sand.u32 1, %s1605_s28   ;;  %p2161_p2 = scmp.ne.s32.totalorder %s2155_s3, 0 }
  0x80   : > { %s1960_s14 = sshll.u32 %s400_s25, 4 }
  0x81   : > { %s402_s20 = scalar_lea.vmem [#allocation8], %s1960_s14 }
  0x82   : > { %1592 = dma.done.wait (%p2161_p2), %s386_s24, 2304  }
  0x83   : > { %1594 = vsyncadd (%p2161_p2), %s386_s24, 4294964992  ;;  %s1107_s10 = sshll.u32 %s400_s25, 6  ;;  %p472_p3 = scmp.lt.s32.totalorder %s1625_s11, 1 }
  0x84   : > { %s1974_s23 = scalar_lea.vmem [#allocation9], %s1107_s10  ;;  %s1976_s26 = scalar_lea.vmem [#allocation10], %s1107_s10 }
  0x85   : > { %s473_s8 = scalar_select %p472_p3, %s1625_s11, 1 }
  0x86   : > { %s471_s0 = scalar_lea.vmem [#allocation11], %s1948_s2  ;;  %p1111_p6 = scmp.ne.s32.totalorder %s1625_s11, 0 }
  0x87   : > { %s1110_s16 = sshll.u32 %s473_s8, 3 }
  0x88   : > { %s1972_s12 = scalar_lea.vmem %s2117_s7, %s1110_s16  ;;  %480 = sbr.rel (%p1111_p6) target bundleno = 453 (0x1c5), region = 76 }
  0x8d   : > { %v481_v0 = vld [vmem:[#allocation6] sm:$0xff]  ;;  %v484_v1 = vld [vmem:[%s389_s27] sm:$0xff]  ;;  %v1112_v14 = vld [vmem:[#allocation6 + $0x8] ss:$0 sm:$0xff] }
  0x8e   : > { %v485_v2 = vadd.f32 %v484_v1, %v481_v0  ;;  %v1113_v16 = vld [vmem:[#allocation6 + $0x9] ss:$0 sm:$0xff] }
  0x90   : > { %486 = vadd.xlane.f32.xlu0 %v485_v2 }
 0x119   : > { %v487_v3 = vpop.xlane.xlu0 %486 }
 0x11a   : > { %v488_v4 = vmul.f32 0.03125, %v487_v3 }
 0x11c   : > { %v489_v5 = vsub.f32 %v485_v2, %v488_v4  ;;  %v493_v7 = vmul.f32 96.0, %v488_v4 }
 0x11e   : > { %v490_v6 = vmul.f32 %v489_v5, %v489_v5  ;;  %v494_v8 = vmul.f32 %v493_v7, %v488_v4 }
 0x120   : > { %491 = vadd.xlane.f32.xlu0 %v490_v6 }
 0x1a9   : > { %v492_v9 = vpop.xlane.xlu0 %491 }
 0x1aa   : > { %v495_v10 = vsub.f32 %v492_v9, %v494_v8 }
 0x1ac   : > { %v496_v11 = vmul.f32 0.03125, %v495_v10 }
 0x1ae   : > { %v497_v12 = vadd.f32 1e-12, %v496_v11 }
 0x1b0   : > { %1350 = vrsqrt.f32 %v497_v12 }
 0x1bd   : > { %v1351_v13 = vpop.eup %1350 }
 0x1be   : > { %v499_v15 = vmul.f32 %v1351_v13, %v489_v5 }
 0x1c0   : > { %v504_v17 = vmul.f32 %v1112_v14, %v499_v15 }
 0x1c2   : > { %v509_v18 = vadd.f32 %v1113_v16, %v504_v17 }
 0x1c4   : > { %510 = vst [vmem:[#allocation2] sm:$0xff] %v509_v18 }
 0x1c5 PF: > { %vm525_vm0 = vcmask 1043456   ;;  %v1652_v20 = vmov 0.0   ;;  %vm1653_vm1 = vmmov 0   ;;  %s2162_s4 = sld [smem:[#allocation25_spill]]  ;;  %vm521_vm2 = vcmask 64512   ;;  %v570_v25 = vld [vmem:[%s402_s20] sm:$0xff] }
 0x1c6   : > { %1164 = vmatprep.subr.bf16.mxu0 %v1652_v20  ;;  %1166 = vmatprep.mubr.msk.bf16.mxu0 %vm1653_vm1, %v1652_v20  ;;  %v571_v26 = vld [vmem:[%s402_s20 + $0x8] sm:$0xff]  ;;  %s2163_s25 = sld [smem:[#allocation26_spill]]  ;;  %vm580_vm3 = vcmask 130048   ;;  %v1354_v48 = vld [vmem:[%s1974_s23 + $0x30] sm:$0xff]   ;;  %v1356_v50 = vld [vmem:[%s1974_s23 + $0x20] sm:$0xff]   ;;  %v638_v61 = vlaneseq  ;;  %p1133_p10 = scmp.ge.s32.totalorder %s1625_s11, 1 }
 0x1c7   : > { %1170 = vmatprep.subr.bf16.mxu1 %v1652_v20  ;;  %1172 = vmatprep.mubr.msk.bf16.mxu1 %vm1653_vm1, %v1652_v20  ;;  %v1353_v43 = vld [vmem:[%s1974_s23 + $0x38] sm:$0xff]   ;;  %v1355_v49 = vld [vmem:[%s1974_s23 + $0x28] sm:$0xff]   ;;  %v1358_v52 = vld [vmem:[%s1974_s23 + $0x10] sm:$0xff]  }
 0x1c8   : > { %v1357_v51 = vld [vmem:[%s1974_s23 + $0x18] sm:$0xff]   ;;  %v1359_v53 = vld [vmem:[%s1974_s23 + $0x8] sm:$0xff]   ;;  %v1360_v54 = vld [vmem:[%s1974_s23] sm:$0xff]   ;;  %v2017_v62 = vshrl.u32 %v638_v61, 7 }
 0x1c9   : > { %v2021_v0 = vld [vmem:[%s1972_s12] sm:$0xff]  ;;  %v1362_v10 = vld [vmem:[%s1976_s26 + $0x30] sm:$0xff]   ;;  %v1363_v11 = vld [vmem:[%s1976_s26 + $0x28] sm:$0xff]  }
 0x1ca   : > { %v640_v63 = vsub.s32 1, %v2017_v62  ;;  %v645_v1 = vsub.s32 2, %v2017_v62  ;;  %v1361_v9 = vld [vmem:[%s1976_s26 + $0x38] sm:$0xff]   ;;  %v1364_v12 = vld [vmem:[%s1976_s26 + $0x20] sm:$0xff]   ;;  %v1366_v14 = vld [vmem:[%s1976_s26 + $0x10] sm:$0xff]   ;;  %v667_v17 = vsub.s32 0, %v2017_v62 }
 0x1cb   : > { %v511_v19 = vld [vmem:[#allocation2] sm:$0xff]  ;;  %v1367_v15 = vld [vmem:[%s1976_s26 + $0x8] sm:$0xff]   ;;  %v1368_v16 = vld [vmem:[%s1976_s26] sm:$0xff]  }
 0x1cc   : > { %v512_v21 = vpack.c.bf16 %v511_v19, %v511_v19  ;;  %v1352_v22 = vld [vmem:[%s2162_s4] sm:$0xff]   ;;  %v641_v2 = vrot.slane %v2021_v0, %v640_v63  ;;  %v646_v5 = vrot.slane %v2021_v0, %v645_v1  ;;  %v668_v18 = vrot.slane %v2021_v0, %v667_v17 }
 0x1cd   : > { %v579_v37 = vld [vmem:[%s2163_s25] sm:$0xf] }
 0x1ce   : > { %v527_v23 = vsel %vm525_vm0, %v512_v21, 0  ;;  %v1365_v13 = vld [vmem:[%s1976_s26 + $0x18] sm:$0xff]  }
 0x1cf   : > { %1165 = vmatpush3.bf16.msra.mxu0 %v527_v23 }
 0x1d0   : > { %1176 = vmatprep.subr.bf16.mxu0 %v1652_v20 }
 0x1d2   : > { %1167 = vmatmul.mubr.msk.bf16.vlgmr.msra.gmra.mxu0 %vm521_vm2, %v1352_v22 }
 0x1d3   : > { %1192 = vmatprep.mubr.msk.bf16.mxu0 %vm1653_vm1, %v1652_v20  ;;  %1177 = vmatpush3.bf16.msra.mxu0 %v1353_v43 }
 0x1d4   : > { %1178 = vmatprep.subr.bf16.mxu0 %v1652_v20 }
 0x1d7   : > { %1179 = vmatpush3.bf16.msra.mxu0 %v1354_v48 }
 0x1d8   : > { %1180 = vmatprep.subr.bf16.mxu0 %v1652_v20 }
 0x1db   : > { %1181 = vmatpush3.bf16.msra.mxu0 %v1355_v49 }
 0x1dc   : > { %1182 = vmatprep.subr.bf16.mxu0 %v1652_v20 }
 0x1df   : > { %1183 = vmatpush3.bf16.msra.mxu0 %v1356_v50 }
 0x1e0   : > { %1184 = vmatprep.subr.bf16.mxu0 %v1652_v20 }
 0x1e3   : > { %1185 = vmatpush3.bf16.msra.mxu0 %v1357_v51 }
 0x1e4   : > { %1186 = vmatprep.subr.bf16.mxu0 %v1652_v20 }
 0x1e7   : > { %1187 = vmatpush3.bf16.msra.mxu0 %v1358_v52  ;;  %v892_v52 = vsub.s32 3, %v2017_v62 }
 0x1e8   : > { %1188 = vmatprep.subr.bf16.mxu0 %v1652_v20 }
 0x1eb   : > { %1189 = vmatpush3.bf16.msra.mxu0 %v1359_v53  ;;  %v897_v53 = vsub.s32 4, %v2017_v62 }
 0x1ec   : > { %1190 = vmatprep.subr.bf16.mxu0 %v1652_v20 }
 0x1ef   : > { %1191 = vmatpush3.bf16.msra.mxu0 %v1360_v54  ;;  %v893_v54 = vrot.slane %v2021_v0, %v892_v52 }
 0x292   : > { %v563_v24 = vpop.f32.mrf.mxu0 }
 0x293   : > { %v572_v29 = vmul.f32 %v570_v25, %v563_v24  ;;  %v575_v30 = vmul.f32 %v571_v26, %v563_v24 }
 0x294   : > { %v1168_v27 = vpop.f32.mrf.mxu0 }
 0x296   : > { %v566_v28 = vpop.f32.mrf.mxu0 }
 0x297   : > { %v573_v31 = vmul.f32 %v571_v26, %v566_v28  ;;  %v576_v32 = vmul.f32 %v570_v25, %v566_v28 }
 0x298   : > { %v1169_v33 = vpop.f32.mrf.mxu0 }
 0x299   : > { %v574_v34 = vsub.f32 %v572_v29, %v573_v31  ;;  %v577_v35 = vadd.f32 %v576_v32, %v575_v30 }
 0x29b   : > { %v578_v36 = vpack.c.bf16 %v577_v35, %v574_v34  ;;  %v785_v34 = vsub.s32 5, %v2017_v62 }
 0x29d   : > { %1171 = vmatpush3.bf16.msra.mxu1 %v578_v36  ;;  %v786_v35 = vrot.slane %v2021_v0, %v785_v34 }
 0x29e   : > { %1196 = vmatprep.subr.bf16.mxu1 %v1652_v20 }
 0x2a0   : > { %1173 = vmatmul.mubr.msk.bf16.vlgmr.msra.gmra.mxu1 %vm580_vm3, %v579_v37 }
 0x2a1   : > { %1212 = vmatprep.mubr.msk.bf16.mxu1 %vm1653_vm1, %v1652_v20  ;;  %1197 = vmatpush3.bf16.msra.mxu1 %v1361_v9 }
 0x2a2   : > { %1198 = vmatprep.subr.bf16.mxu1 %v1652_v20 }
 0x2a5   : > { %1199 = vmatpush3.bf16.msra.mxu1 %v1362_v10 }
 0x2a6   : > { %1200 = vmatprep.subr.bf16.mxu1 %v1652_v20 }
 0x2a9   : > { %1201 = vmatpush3.bf16.msra.mxu1 %v1363_v11 }
 0x2aa   : > { %1202 = vmatprep.subr.bf16.mxu1 %v1652_v20 }
 0x2ad   : > { %1203 = vmatpush3.bf16.msra.mxu1 %v1364_v12 }
 0x2ae   : > { %1204 = vmatprep.subr.bf16.mxu1 %v1652_v20 }
 0x2b1   : > { %1205 = vmatpush3.bf16.msra.mxu1 %v1365_v13 }
 0x2b2   : > { %1206 = vmatprep.subr.bf16.mxu1 %v1652_v20 }
 0x2b5   : > { %1207 = vmatpush3.bf16.msra.mxu1 %v1366_v14 }
 0x2b6   : > { %1208 = vmatprep.subr.bf16.mxu1 %v1652_v20 }
 0x2b9   : > { %1209 = vmatpush3.bf16.msra.mxu1 %v1367_v15 }
 0x2ba   : > { %1210 = vmatprep.subr.bf16.mxu1 %v1652_v20 }
 0x2bd   : > { %1211 = vmatpush3.bf16.msra.mxu1 %v1368_v16 }
 0x360   : > { %v618_v38 = vpop.f32.mrf.mxu1 }
 0x361   : > { %v619_v39 = vadd.f32 %v618_v38, %v511_v19 }
 0x362   : > { %v1174_v40 = vpop.f32.mrf.mxu1 }
 0x363   : > { %624 = vadd.xlane.f32.xlu0 %v619_v39 }
 0x364   : > { %v621_v41 = vpop.f32.mrf.mxu1 }
 0x366   : > { %v1175_v42 = vpop.f32.mrf.mxu1 }
 0x3ec   : > { %v625_v44 = vpop.xlane.xlu0 %624 }
 0x3ed   : > { %v626_v45 = vmul.f32 0.03125, %v625_v44 }
 0x3ef   : > { %v627_v46 = vsub.f32 %v619_v39, %v626_v45  ;;  %v631_v55 = vmul.f32 96.0, %v626_v45 }
 0x3f1   : > { %v628_v47 = vmul.f32 %v627_v46, %v627_v46  ;;  %v632_v56 = vmul.f32 %v631_v55, %v626_v45 }
 0x3f3   : > { %629 = vadd.xlane.f32.xlu0 %v628_v47 }
 0x47c   : > { %v630_v57 = vpop.xlane.xlu0 %629 }
 0x47d   : > { %v633_v58 = vsub.f32 %v630_v57, %v632_v56  ;;  %v898_v56 = vrot.slane %v2021_v0, %v897_v53 }
 0x47f   : > { %v634_v59 = vmul.f32 0.03125, %v633_v58 }
 0x481   : > { %v635_v60 = vadd.f32 1e-12, %v634_v59 }
 0x483   : > { %1369 = vrsqrt.f32 %v635_v60 }
 0x490   : > { %v1370_v3 = vpop.eup %1369 }
 0x491   : > { %v637_v4 = vmul.f32 %v1370_v3, %v627_v46 }
 0x493   : > { %v642_v6 = vmul.f32 %v641_v2, %v637_v4 }
 0x495   : > { %v647_v7 = vadd.f32 %v646_v5, %v642_v6 }
 0x497   : > { %v648_v8 = vpack.c.bf16 %v647_v7, %v647_v7 }
 0x499   : > { %1193 = vmatmul.mubr.bf16.vlgmr.msra.gmra.mxu0 %v648_v8 }
 0x559   : > { %v751_v19 = vpop.f32.mrf.mxu0 }
 0x55a   : > { %v752_v21 = vadd.f32 %v751_v19, %v668_v18 }
 0x55b   : > { %v1194_v22 = vpop.f32.mrf.mxu0 }
 0x55c   : > { %v758_v23 = vmul.f32 0.044715, %v752_v21  ;;  %v757_v31 = vmul.f32 0.5, %v752_v21 }
 0x55d   : > { %v754_v24 = vpop.f32.mrf.mxu0 }
 0x55e   : > { %v759_v25 = vmul.f32 %v758_v23, %v752_v21 }
 0x55f   : > { %v1195_v26 = vpop.f32.mrf.mxu0 }
 0x560   : > { %v760_v27 = vmul.f32 %v759_v25, %v752_v21 }
 0x562   : > { %v761_v28 = vadd.f32 %v760_v27, %v752_v21 }
 0x564   : > { %v762_v29 = vmul.f32 0.7978846, %v761_v28 }
 0x566   : > { %1371 = vtanh.f32 %v762_v29 }
 0x573   : > { %v1372_v30 = vpop.eup %1371 }
 0x574   : > { %v764_v32 = vadd.f32 1.0, %v1372_v30 }
 0x576   : > { %v765_v20 = vmul.f32 %v764_v32, %v757_v31 }
 0x578   : > { %v766_v33 = vpack.c.bf16 %v765_v20, %v765_v20 }
 0x57a   : > { %1213 = vmatmul.mubr.bf16.vlgmr.msra.gmra.mxu1 %v766_v33 }
 0x63a   : > { %v869_v36 = vpop.f32.mrf.mxu1 }
 0x63b   : > { %v870_v37 = vadd.f32 %v869_v36, %v786_v35 }
 0x63c   : > { %v1214_v38 = vpop.f32.mrf.mxu1 }
 0x63d   : > { %v875_v39 = vadd.f32 %v870_v37, %v647_v7 }
 0x63e   : > { %v872_v40 = vpop.f32.mrf.mxu1 }
 0x63f   : > { %876 = vadd.xlane.f32.xlu1 %v875_v39 }
 0x640   : > { %v1215_v41 = vpop.f32.mrf.mxu1 }
 0x6c8   : > { %v877_v42 = vpop.xlane.xlu1 %876 }
 0x6c9   : > { %v878_v43 = vmul.f32 0.03125, %v877_v42 }
 0x6cb   : > { %v879_v44 = vsub.f32 %v875_v39, %v878_v43  ;;  %v883_v46 = vmul.f32 96.0, %v878_v43 }
 0x6cd   : > { %v880_v45 = vmul.f32 %v879_v44, %v879_v44  ;;  %v884_v47 = vmul.f32 %v883_v46, %v878_v43 }
 0x6cf   : > { %881 = vadd.xlane.f32.xlu1 %v880_v45 }
 0x758   : > { %v882_v48 = vpop.xlane.xlu1 %881 }
 0x759   : > { %v885_v49 = vsub.f32 %v882_v48, %v884_v47 }
 0x75b   : > { %v886_v50 = vmul.f32 0.03125, %v885_v49 }
 0x75d   : > { %v887_v51 = vadd.f32 1e-12, %v886_v50 }
 0x75f   : > { %1373 = vrsqrt.f32 %v887_v51 }
 0x76c   : > { %v1374_v55 = vpop.eup %1373 }
 0x76d   : > { %v889_v57 = vmul.f32 %v1374_v55, %v879_v44  ;;  %903 = sbr.rel (%p1133_p10) target bundleno = 1908 (0x774), region = 80 }
 0x76f   : > { %v894_v58 = vmul.f32 %v893_v54, %v889_v57 }
 0x771   : > { %v899_v59 = vadd.f32 %v898_v56, %v894_v58 }
 0x773   : > { %904 = vst [vmem:[#allocation2] sm:$0xff] %v899_v59 }
 0x774 PF: > { %p1134_p1 = scmp.ne.s32.totalorder %s1625_s11, 1 }
 0x776   : > { %908 = sbr.rel (%p1134_p1) target bundleno = 1916 (0x77c), region = 84 }
 0x77b   : > { %909 = vst [vmem:[%s471_s0] sm:$0xff] %v899_v59 }
 0x77c PF: > { %s2164_s14 = sld [smem:[#allocation17_spill]]  ;;  %s924_s21 = sshll.u32 %s471_s0, 4  ;;  %s925_s21 = int_to_ptr.vmem [resolvable:$true] %s924_s21 }
 0x77d   : > { %s2165_s16 = sld [smem:[#allocation28_spill]]  ;;  %s911_s12 = scalar_lea.sflag [#allocation5], %s387_s17 }
 0x77e   : > { %s1513_s11 = scalar_lea.vmem %s925_s21, 128  ;;  %p2166_p4 = scmp.ne.s32.totalorder %s2145_s18, 0 }
 0x77f   : > { %p1514_p13 = scmp.ne.s32.totalorder %s925_s21, %s1513_s11  ;;  %s1654_s23 = smov [#allocation11]  }
 0x780   : > { %s1517_s26 = sshll.u32 %s1654_s23, 4  ;;  %s1518_s26 = int_to_ptr.vmem [resolvable:$false] %s1517_s26 }
 0x781   : > { %p1515_p5 = pnand %p1514_p13, %p2166_p4  ;;  %s1519_s3 = scalar_lea.vmem %s1518_s26, 256 }
 0x782   : > { %s1136_s20 = sshll.u32 %s2164_s14, 7  ;;  %p1520_p8 = scmp.lt.s32.totalorder %s925_s21, %s1518_s26 }
 0x783   : > { %s922_s22 = scalar_lea.hbm %s2165_s16, %s1136_s20  ;;  %p1516_p7 = pneg %p1515_p5 }
 0x784   : > { %p1521_p12 = scmp.lt.s32.totalorder %s1519_s3, %s1513_s11 }
 0x786   : > { %p1522_p0 = por %p1521_p12, %p1520_p8 }
 0x788   : > { %p1523_p9 = pnand %p1522_p0, %p1516_p7 }
 0x78a   : > { %1526 = shalt.err (!%p1523_p9)
}
 0x78b   : > { %s1527_s19 = scalar_lea.hbm %s922_s22, 128  ;;  %s1531_s0 = scalar_lea.hbm %s2165_s16, 256 }
 0x78c   : > { %p1528_p11 = scmp.ne.s32.totalorder %s922_s22, %s1527_s19  ;;  %p1532_p6 = scmp.lt.s32.totalorder %s922_s22, %s2165_s16 }
 0x78d   : > { %p1533_p10 = scmp.lt.s32.totalorder %s1531_s0, %s1527_s19 }
 0x78e   : > { %p1529_p2 = pnand %p1528_p11, %p2166_p4 }
 0x78f   : > { %p1534_p1 = por %p1533_p10, %p1532_p6 }
 0x790   : > { %p1530_p3 = pneg %p1529_p2 }
 0x792   : > { %p1535_p13 = pnand %p1534_p1, %p1530_p3 }
 0x794   : > { %1538 = shalt.err (!%p1535_p13)
}
 0x795   : > { %1228 = dma.vmem_to_hbm [thread:$0]  (%p2166_p4), %s925_s21, 128, %s922_s22, %s911_s12  }
 0x796 PF: > { %s2167_s27 = sld [smem:[#allocation23_spill]]  ;;  %p1254_p5 = scmp.ge.s32.totalorder %s1641_s15, 2 }
 0x797   : > { %s936_s25 = sand.u32 1, %s1613_s30  }
 0x798   : > { %s937_s14 = scalar_lea.sflag [#allocation5], %s936_s25 }
 0x79c   : > { %p2168_p7 = scmp.ne.s32.totalorder %s2167_s27, 0 }
 0x79e   : > { %p1248_p8 = pnand %p1254_p5, %p2168_p7 }
 0x7a0   : > { %p1249_p12 = pneg %p1248_p8 }
 0x7a2   : > { %1596 = dma.done.wait (%p1249_p12), %s937_s14, 128  }
 0x7a3   : > { %1598 = vsyncadd (%p1249_p12), %s937_s14, 4294967168  ;;  %s25_s15 = sadd.s32 1, %s1641_s15   ;;  %s2169_s20 = sld [smem:[#allocation21_spill]] }
 0x7a4   : > { %p22_p0 = scmp.ge.s32.totalorder %s25_s15, 6   ;;  %s2170_s18 = sld [smem:[#allocation16_spill]] }
 0x7a5   : > { %s2171_s10 = sld [smem:[#allocation22_spill]]  ;;  %s2175_s27 = smov %s1605_s28 }
 0x7a6   : > { %s2172_s12 = sld [smem:[#allocation18_spill]]  ;;  %s2176_s28 = smov %s1609_s29 }
 0x7a7   : > { %s2173_s8 = sld [smem:[#allocation19_spill]]  ;;  %s2178_s30 = smov %s1617_s9 }
 0x7a8   : > { %s2174_s14 = sld [smem:[#allocation20_spill]]  ;;  %s2180_s11 = smov %s1633_s13 }
 0x7a9   : > { %s2177_s29 = smov %s2169_s20  ;;  %24 = sbr.rel (!%p22_p0) target bundleno = 16 (0x10), region = 149 }
 0x7aa   : > { %s2179_s9 = smov %s2170_s18 }
 0x7ad   : > { %s2181_s13 = smov %s2173_s8 }
 0x7ae   :  { %942 = vsyncpa [#allocation4], 1 }
 0x7af   :  { %944 = vsyncpa [#allocation4 + $0x1], 1 }
 0x7b0   :  { %945 = vsyncpa [#allocation7], 1 }
 0x7b1   :  { %946 = vsyncpa [#allocation5], 1 }
 0x7b2   :  { %948 = vsyncpa [#allocation5 + $0x1], 1 }

</bundles_post_ra>
